<compile_context>
chip_gen: v7x
topology: tpu7x:2x2x1
jax: 0.10.0
libtpu: 0.0.40
codegen_flags: <defaults>
</compile_context>

<pallas_src>
import jax
import jax.numpy as jnp
from jax.experimental import pallas as pl
from jax.experimental.pallas import tpu as pltpu


LANE = 128
SUBLANE = 8
_MAX_LANES = 8192                       # widest lane-dense block considered
_BLOCK_BYTES_TARGET = 4 * 1024 * 1024   # ~4 MiB/block; 4x (in+out, dbl-buffered) = 16 MiB
_VMEM_LIMIT_BYTES = 32 * 1024 * 1024    # above v5e's 16 MiB default, within v7x's 64 MiB


def _identity_kernel(x_ref, o_ref):
    # Pure pass-through: load the whole tile, store it to the (aliased) output.
    o_ref[...] = x_ref[...]


def _identity_copy_2d(x2d, tile_rows):
    """Tiled, lane-dense identity copy of a (rows, cols) array."""
    rows, cols = x2d.shape
    grid = (rows // tile_rows,)
    return pl.pallas_call(
        _identity_kernel,
        out_shape=jax.ShapeDtypeStruct((rows, cols), x2d.dtype),
        grid_spec=pltpu.PrefetchScalarGridSpec(
            num_scalar_prefetch=0,
            grid=grid,
            in_specs=[pl.BlockSpec((tile_rows, cols), lambda i: (i, 0))],
            out_specs=pl.BlockSpec((tile_rows, cols), lambda i: (i, 0)),
        ),
        # Output == input: alias buffers so XLA can reuse the input HBM buffer
        # (no second allocation / write) whenever the input is donated or dead.
        input_output_aliases={0: 0},
        compiler_params=pltpu.CompilerParams(
            dimension_semantics=("parallel",),
            vmem_limit_bytes=_VMEM_LIMIT_BYTES,
        ),
        cost_estimate=pl.CostEstimate(
            flops=0,
            transcendentals=0,
            bytes_accessed=2 * x2d.size * jnp.dtype(x2d.dtype).itemsize,
        ),
    )(x2d)


def _largest_divisor_le(n, cap):
    """Largest divisor of n that is <= cap (cap is small, loop is trace-time)."""
    for d in range(min(cap, n), 0, -1):
        if n % d == 0:
            return d
    return 1


def _pick_lane_width(n_elem):
    """Largest multiple of 128 that divides n_elem, capped at _MAX_LANES."""
    m = n_elem // LANE
    return LANE * _largest_divisor_le(m, _MAX_LANES // LANE)


def _pick_tile_rows(rows, cols, itemsize):
    """Row tile: multiple of 8 dividing `rows`, within the block-byte budget.

    Returns `rows` (single full-dim block, always legal) when the whole slab
    fits the budget, or None when no legal tiling exists (caller pads).
    """
    if rows * cols * itemsize <= _BLOCK_BYTES_TARGET:
        return rows
    if rows % SUBLANE != 0:
        return None
    budget_rows = max(SUBLANE, _BLOCK_BYTES_TARGET // (cols * itemsize))
    k_max = min(budget_rows // SUBLANE, rows // SUBLANE)
    for k in range(k_max, 0, -1):
        if (rows // SUBLANE) % k == 0:
            return SUBLANE * k
    return SUBLANE  # k = 1 always divides; unreachable


def _identity_copy_padded(x_flat):
    """Fallback for element counts with no clean lane-dense factorization:
    pad the flat array up to a tileable (rows, 128) slab, copy, slice back."""
    n = x_flat.shape[0]
    itemsize = jnp.dtype(x_flat.dtype).itemsize
    rows = pl.cdiv(n, LANE)
    rows = pl.cdiv(rows, SUBLANE) * SUBLANE                  # sublane-align
    budget_rows = max(
        SUBLANE, (_BLOCK_BYTES_TARGET // (LANE * itemsize)) // SUBLANE * SUBLANE
    )
    tile_rows = min(budget_rows, rows)
    rows = pl.cdiv(rows, tile_rows) * tile_rows              # rows % tile_rows == 0
    pad = rows * LANE - n
    x2d = jnp.pad(x_flat, (0, pad)).reshape(rows, LANE)
    y2d = _identity_copy_2d(x2d, tile_rows)
    return y2d.reshape(rows * LANE)[:n]


def print_layer(x):
    """PrintLayer.forward: print the shape, return x unchanged.

    Note: the zero-cost implementation is `print(x.shape); return x` (no
    kernel, no HBM traffic). The aliased Pallas copy below is kept so the
    module still exercises a TPU kernel on the data path.
    """
    # Trace-time side effect, exactly like the PyTorch `print(x.shape)`.
    # TODO(synk): under jit this prints once per compilation, not per call.
    print(x.shape)

    n_elem = x.size
    if n_elem == 0:
        return x

    orig_shape = x.shape
    itemsize = jnp.dtype(x.dtype).itemsize

    if n_elem % LANE == 0:
        cols = _pick_lane_width(n_elem)
        rows = n_elem // cols
        tile_rows = _pick_tile_rows(rows, cols, itemsize)
        if tile_rows is not None:
            y2d = _identity_copy_2d(x.reshape(rows, cols), tile_rows)
            return y2d.reshape(orig_shape)

    # Ragged / un-tileable element count: pad -> tiled copy -> slice back.
    return _identity_copy_padded(x.reshape(n_elem)).reshape(orig_shape)


if __name__ == "__main__":
    key = jax.random.PRNGKey(0)
    # NCHW input, small shapes: batch=2, channels=4, spatial=16x16.
    x = jax.random.normal(key, (2, 4, 16, 16), dtype=jnp.float32)

    y = print_layer(x)
    y = jax.block_until_ready(y)

    assert y.shape == x.shape
    assert y.dtype == x.dtype
    assert bool(jnp.all(y == x))

    # Exercise the ragged-size fallback path as well (105 elements, not a
    # multiple of 128).
    k2 = jax.random.PRNGKey(0)
    x2 = jax.random.normal(k2, (3, 5, 7), dtype=jnp.float32)
    y2 = jax.block_until_ready(print_layer(x2))
    assert y2.shape == x2.shape and y2.dtype == x2.dtype
    assert bool(jnp.all(y2 == x2))

    print("KERNEL_OK")
</pallas_src>

<mosaic_0001>
module attributes {stable_mosaic.version = 11 : i64} {
  func.func @_identity_kernel(%arg0: i32, %arg1: memref<1x2048xf32, #tpu.memory_space<vmem>>, %arg2: memref<1x2048xf32, #tpu.memory_space<vmem>>) attributes {dimension_semantics = [#tpu.dimension_semantics<parallel>], iteration_bounds = array<i64: 1>, scalar_prefetch = 0 : i64, scratch_operands = 0 : i64, tpu.core_type = #tpu.core_type<tc>, window_params = [{transform_indices = @transform_0, window_bounds = array<i64: 1, 2048>}, {transform_indices = @transform_1, window_bounds = array<i64: 1, 2048>}]} {
    %c0 = arith.constant 0 : index
    %c0_0 = arith.constant 0 : index
    %0 = vector.load %arg1[%c0, %c0_0] : memref<1x2048xf32, #tpu.memory_space<vmem>>, vector<1x2048xf32>
    %c0_1 = arith.constant 0 : index
    %c0_2 = arith.constant 0 : index
    %1 = vector.load %arg2[%c0_1, %c0_2] : memref<1x2048xf32, #tpu.memory_space<vmem>>, vector<1x2048xf32>
    tpu.vector_store %arg2[%c0_1, %c0_2], %0 {strides = array<i32>} : memref<1x2048xf32, #tpu.memory_space<vmem>>, vector<1x2048xf32>,
    return
  }
  func.func @transform_0(%arg0: i32) -> (i32, i32) {
    %c0_i32 = arith.constant 0 : i32
    %c0_i32_0 = arith.constant 0 : i32
    return %arg0, %c0_i32 : i32, i32
  }
  func.func @transform_1(%arg0: i32) -> (i32, i32) {
    %c0_i32 = arith.constant 0 : i32
    %c0_i32_0 = arith.constant 0 : i32
    return %arg0, %c0_i32 : i32, i32
  }
}

</mosaic_0001>

<bundles_post_ra>
// kernel: tpu_custom_call.1
= control target key start
LH: loop header
LB: loop body
LE: loop exit
PB: predicated region body
PF: predicated region fallthrough
CT: control target
= control target key end

     0   :  { %6 = vsyncpa [#allocation3], 0  ;;  %s126_s0 = inlined_call_operand.hbm [shape: f32[1,2048], index: 0, kind: input, shape index: {}, may-alias: {0,1}]   ;;  %s127_s1 = inlined_call_operand.hbm [shape: f32[1,2048], index: 1, kind: output, shape index: {}, may-alias: {0,1}]  }
   0x1   :  { %7 = vsyncpa [#allocation4], 0  ;;  %s90_s6 = smov [#allocation2]   ;;  %s42_s10 = scalar_lea.hbm %s126_s0, 256 }
   0x2   :  { %s14_s7 = sshll.u32 %s90_s6, 4  ;;  %p43_p0 = scmp.ne.s32.totalorder %s126_s0, %s42_s10  ;;  %s15_s7 = int_to_ptr.vmem [resolvable:$true] %s14_s7 }
   0x3   :  { %p46_p1 = scmp.lt.u32.totalorder %s42_s10, %s126_s0 }
   0x5   :  { %p48_p2 = pnand %p46_p1, %p43_p0 }
   0x7   :  { %51 = shalt.err (!%p48_p2)
}
   0x8   :  { %s52_s15 = scalar_lea.vmem %s15_s7, 256  ;;  %p57_p4 = scmp.lt.s32.totalorder %s15_s7, %s15_s7 }
   0x9   :  { %p53_p3 = scmp.ne.s32.totalorder %s15_s7, %s52_s15  ;;  %p58_p5 = scmp.lt.s32.totalorder %s52_s15, %s52_s15 }
   0xb   :  { %p59_p6 = por %p58_p5, %p57_p4 }
   0xd   :  { %p60_p7 = pnand %p59_p6, %p53_p3 }
   0xf   :  { %63 = shalt.err (!%p60_p7)
}
  0x10   :  { %17 = dma.hbm_to_vmem [thread:$0]  %s126_s0, 256, %s15_s7, [#allocation3]  }
  0x11   :  { %86 = dma.done.wait [#allocation3], 256  }
  0x12   :  { %87 = vsyncadd [#allocation3], 4294967040  ;;  %s91_s18 = smov [#allocation5]   ;;  %v21_v0 = vld [vmem:[#allocation2] sm:$0xff]  ;;  %v22_v1 = vld [vmem:[#allocation2 + $0x8] sm:$0xff] }
  0x13   :  { %s31_s19 = sshll.u32 %s91_s18, 4  ;;  %23 = vst [vmem:[#allocation5] sm:$0xff] %v21_v0  ;;  %24 = vst [vmem:[#allocation5 + $0x8] sm:$0xff] %v22_v1  ;;  %s32_s19 = int_to_ptr.vmem [resolvable:$true] %s31_s19 }
  0x14   :  { %s64_s20 = scalar_lea.vmem %s32_s19, 256  ;;  %p69_p9 = scmp.lt.s32.totalorder %s32_s19, %s32_s19 }
  0x15   :  { %p65_p8 = scmp.ne.s32.totalorder %s32_s19, %s64_s20  ;;  %p70_p10 = scmp.lt.s32.totalorder %s64_s20, %s64_s20 }
  0x17   :  { %p71_p11 = por %p70_p10, %p69_p9 }
  0x19   :  { %p72_p12 = pnand %p71_p11, %p65_p8 }
  0x1b   :  { %75 = shalt.err (!%p72_p12)
}
  0x1c   :  { %s76_s0 = scalar_lea.hbm %s127_s1, 256 }
  0x1d   :  { %p77_p13 = scmp.ne.s32.totalorder %s127_s1, %s76_s0  ;;  %p80_p0 = scmp.lt.u32.totalorder %s76_s0, %s127_s1 }
  0x1f   :  { %p82_p1 = pnand %p80_p0, %p77_p13 }
  0x21   :  { %85 = shalt.err (!%p82_p1)
}
  0x22   :  { %34 = dma.vmem_to_hbm [thread:$0]  %s32_s19, 256, %s127_s1, [#allocation4]  }
  0x23   :  { %88 = dma.done.wait [#allocation4], 256  }
  0x24   :  { %89 = vsyncadd [#allocation4], 4294967040 }
  0x25   :  { %38 = vsyncpa [#allocation3], 1 }
  0x26   :  { %39 = vsyncpa [#allocation4], 1 }

</bundles_post_ra>
